<compile_context>
chip_gen: v5e
topology: v5e:2x2
jax: 0.10.0
libtpu: 0.0.40
codegen_flags: <defaults>
</compile_context>

<pallas_src>
import functools

import jax
import jax.numpy as jnp
from jax.experimental import pallas as pl
from jax.experimental.pallas import tpu as pltpu


def _round_up(x: int, m: int) -> int:
    return ((x + m - 1) // m) * m


def make_variational_decoder_kernel(layer_out_dims, non_linear: bool):
    """Kernel ref order: z, W_0 ... W_{L-1}, packed_bias, loc_out.

    layer_out_dims[l] is the (possibly lane-padded, for the last layer) output
    width of layer l. ReLU is applied after every layer except the last
    (dec_mean_layer), matching the PyTorch forward.
    """
    num_layers = len(layer_out_dims)

    def kernel(*refs):
        z_ref = refs[0]
        w_refs = refs[1:1 + num_layers]            # bf16 (d_in, d_out) each
        b_ref = refs[1 + num_layers]               # f32 (num_layers, bias_width)
        loc_ref = refs[2 + num_layers]             # f32 (TB, out_padded)

        x = z_ref[...].astype(jnp.float32)
        for l in range(num_layers):
            w = w_refs[l][...]
            d_out = layer_out_dims[l]
            b = b_ref[l:l + 1, 0:d_out]            # (1, d_out) f32, static slice
            # MXU: bf16 operands, f32 accumulation. Elementwise stays f32.
            x = jnp.dot(x.astype(w.dtype), w,
                        preferred_element_type=jnp.float32) + b
            if non_linear and l < num_layers - 1:
                x = jnp.maximum(x, 0.0)            # F.relu on hidden layers only
        loc_ref[...] = x.astype(loc_ref.dtype)

    return kernel


def init_params(key, z_dim, hidden_layer_dim, input_dim, bias, init_logvar):
    """Deterministic init mirroring the PyTorch module's parameter shapes.

    Linear(d0, d1): torch weight is (d1, d0); we store the transpose (d0, d1).
    Uniform(-1/sqrt(d0), 1/sqrt(d0)) matches nn.Linear's default bound.
    The last (w, b) pair is dec_mean_layer; earlier pairs are decoder_layers.
    """
    layer_sizes = [z_dim] + list(hidden_layer_dim) + [input_dim]
    params = []
    for d0, d1 in zip(layer_sizes[:-1], layer_sizes[1:]):
        key, kw, kb = jax.random.split(key, 3)
        bound = 1.0 / (d0 ** 0.5)
        w = jax.random.uniform(kw, (d0, d1), jnp.float32, -bound, bound)
        if bias:
            b = jax.random.uniform(kb, (1, d1), jnp.float32, -bound, bound)
        else:
            b = jnp.zeros((1, d1), jnp.float32)
        params.append((w, b))
    logvar_out = jnp.full((1, input_dim), float(init_logvar), jnp.float32)
    return params, logvar_out


@functools.partial(jax.jit, static_argnames=("non_linear", "block_rows"))
def variational_decoder_forward(z, params, logvar_out, *, non_linear=True,
                                block_rows=256):
    """Returns (loc, scale): loc = MLP(z), scale = exp(0.5 * logvar_out)."""
    batch, z_dim = z.shape
    input_dim = params[-1][0].shape[1]

    # scale is independent of z -> compute once outside the kernel.
    scale = jnp.exp(0.5 * logvar_out)

    # ---- batch tiling (grid over rows; TB multiple of 8 sublanes) ----
    tb = min(block_rows, _round_up(max(batch, 1), 8))
    b_pad = _round_up(batch, tb)
    z_p = jnp.pad(z, ((0, b_pad - batch), (0, 0)))

    # ---- lane-dense output: pad dec_mean output dim to a multiple of 128 ----
    out_pad = _round_up(input_dim, 128)

    weights = []      # bf16, weights-resident in VMEM across the whole grid
    out_dims = []
    bias_rows = []    # f32 rows, packed below
    num_layers = len(params)
    for idx, (w, b) in enumerate(params):
        if idx == num_layers - 1:  # dec_mean_layer: zero-pad output columns
            w = jnp.pad(w, ((0, 0), (0, out_pad - input_dim)))
            b = jnp.pad(b, ((0, 0), (0, out_pad - input_dim)))
        weights.append(w.astype(jnp.bfloat16))
        out_dims.append(int(w.shape[1]))
        bias_rows.append(b)

    bias_width = _round_up(max(out_dims), 128)
    b_packed = jnp.zeros((num_layers, bias_width), jnp.float32)
    for i, b in enumerate(bias_rows):
        b_packed = b_packed.at[i, :b.shape[1]].set(b[0].astype(jnp.float32))

    kernel = make_variational_decoder_kernel(tuple(out_dims), non_linear)

    grid = (b_pad // tb,)
    in_specs = [pl.BlockSpec((tb, z_dim), lambda i: (i, 0))]
    for w in weights:  # constant index_map -> resident, no per-step re-DMA
        in_specs.append(pl.BlockSpec(w.shape, lambda i: (0, 0)))
    in_specs.append(pl.BlockSpec(b_packed.shape, lambda i: (0, 0)))
    out_specs = pl.BlockSpec((tb, out_pad), lambda i: (i, 0))
    out_shape = jax.ShapeDtypeStruct((b_pad, out_pad), jnp.float32)

    # Advisory cost estimate for the XLA scheduler.
    flops = 2 * b_pad * sum(int(w.shape[0]) * int(w.shape[1]) for w in weights)
    bytes_accessed = (z_p.size * 4 + sum(w.size * 2 for w in weights)
                      + b_packed.size * 4 + b_pad * out_pad * 4)
    cost = pl.CostEstimate(flops=flops, transcendentals=0,
                           bytes_accessed=bytes_accessed)

    # VMEM budget: resident weights/biases + double-buffered z/loc tiles,
    # with generous headroom; clamped so it is safe on v5e/v6e/v7x.
    vmem_need = (sum(w.size * 2 for w in weights) + b_packed.size * 4
                 + 2 * tb * max(z_dim, 128) * 4 + 2 * tb * out_pad * 4)
    vmem_limit = min(max(4 * vmem_need, 8 * 1024 * 1024), 32 * 1024 * 1024)

    loc_p = pl.pallas_call(
        kernel,
        grid=grid,
        in_specs=in_specs,
        out_specs=out_specs,
        out_shape=out_shape,
        compiler_params=pltpu.CompilerParams(
            dimension_semantics=("parallel",),   # batch axis -> both v7x TCs
            vmem_limit_bytes=vmem_limit,
        ),
        cost_estimate=cost,
    )(z_p, *weights, b_packed)

    loc = loc_p[:batch, :input_dim]
    return loc, scale


def reference_forward(z, params, logvar_out, non_linear=True):
    """Pure-JAX reference with the same bf16-weight / f32-accumulate math."""
    x = z.astype(jnp.float32)
    for w, b in params[:-1]:
        x = jnp.dot(x.astype(jnp.bfloat16), w.astype(jnp.bfloat16),
                    preferred_element_type=jnp.float32) + b
        if non_linear:
            x = jnp.maximum(x, 0.0)
    wm, bm = params[-1]
    loc = jnp.dot(x.astype(jnp.bfloat16), wm.astype(jnp.bfloat16),
                  preferred_element_type=jnp.float32) + bm
    scale = jnp.exp(0.5 * logvar_out)
    return loc, scale


if __name__ == "__main__":
    # Small, module-consistent shapes; batch is not a multiple of the row tile
    # and input_dim < 128 so both padding paths are exercised.
    batch = 300
    z_dim = 8
    hidden_layer_dim = [16, 32]   # layer_sizes = [8, 16, 32, 64]
    input_dim = 64
    non_linear = True
    bias = True
    init_logvar = -3.0

    key = jax.random.PRNGKey(0)
    key, kz = jax.random.split(key)
    z = jax.random.normal(kz, (batch, z_dim), jnp.float32)

    params, logvar_out = init_params(
        key, z_dim, hidden_layer_dim, input_dim, bias, init_logvar
    )

    loc, scale = variational_decoder_forward(
        z, params, logvar_out, non_linear=non_linear
    )
    jax.block_until_ready((loc, scale))

    # Correctness check against pure-JAX reference.
    loc_ref, scale_ref = reference_forward(z, params, logvar_out, non_linear)
    assert loc.shape == (batch, input_dim)
    assert scale.shape == (1, input_dim)
    assert jnp.allclose(loc, loc_ref, atol=2e-3, rtol=2e-3), float(
        jnp.max(jnp.abs(loc - loc_ref))
    )
    assert jnp.allclose(scale, scale_ref, atol=1e-6, rtol=1e-6)

    print("KERNEL_OK")
</pallas_src>

<mosaic_0001>
module attributes {stable_mosaic.version = 11 : i64} {
  func.func @kernel(%arg0: i32, %arg1: memref<256x8xf32, #tpu.memory_space<vmem>>, %arg2: memref<8x16xbf16, #tpu.memory_space<vmem>>, %arg3: memref<16x32xbf16, #tpu.memory_space<vmem>>, %arg4: memref<32x128xbf16, #tpu.memory_space<vmem>>, %arg5: memref<3x128xf32, #tpu.memory_space<vmem>>, %arg6: memref<256x128xf32, #tpu.memory_space<vmem>>) attributes {dimension_semantics = [#tpu.dimension_semantics<parallel>], iteration_bounds = array<i64: 2>, scalar_prefetch = 0 : i64, scratch_operands = 0 : i64, tpu.core_type = #tpu.core_type<tc>, window_params = [{transform_indices = @transform_0, window_bounds = array<i64: 256, 8>}, {pipeline_mode = #tpu.pipeline_mode<synchronous>, transform_indices = @transform_1, window_bounds = array<i64: 8, 16>}, {pipeline_mode = #tpu.pipeline_mode<synchronous>, transform_indices = @transform_2, window_bounds = array<i64: 16, 32>}, {pipeline_mode = #tpu.pipeline_mode<synchronous>, transform_indices = @transform_3, window_bounds = array<i64: 32, 128>}, {pipeline_mode = #tpu.pipeline_mode<synchronous>, transform_indices = @transform_4, window_bounds = array<i64: 3, 128>}, {transform_indices = @transform_5, window_bounds = array<i64: 256, 128>}]} {
    %c0 = arith.constant 0 : index
    %c0_0 = arith.constant 0 : index
    %0 = vector.load %arg1[%c0, %c0_0] : memref<256x8xf32, #tpu.memory_space<vmem>>, vector<256x8xf32>
    %c0_1 = arith.constant 0 : index
    %c0_2 = arith.constant 0 : index
    %1 = vector.load %arg2[%c0_1, %c0_2] : memref<8x16xbf16, #tpu.memory_space<vmem>>, vector<8x16xbf16>
    %c0_3 = arith.constant 0 : index
    %c0_4 = arith.constant 0 : index
    %2 = vector.load %arg5[%c0_3, %c0_4] : memref<3x128xf32, #tpu.memory_space<vmem>>, vector<1x16xf32>
    %3 = arith.truncf %0 : vector<256x8xf32> to vector<256x8xbf16>
    %cst = arith.constant dense<0.000000e+00> : vector<256x16xf32>
    %4 = tpu.matmul %3, %1, %cst {dimension_numbers = #tpu.dot_dimension_numbers<[1], [0], [0], [1], [0, 0, 1, 1], [], []>} : vector<256x8xbf16>, vector<8x16xbf16>, vector<256x16xf32> -> vector<256x16xf32>
    %5 = vector.broadcast %2 : vector<1x16xf32> to vector<256x16xf32>
    %6 = arith.addf %4, %5 : vector<256x16xf32>
    %cst_5 = arith.constant 0.000000e+00 : f32
    %7 = vector.broadcast %cst_5 : f32 to vector<256x16xf32>
    %8 = arith.maximumf %6, %7 : vector<256x16xf32>
    %c0_6 = arith.constant 0 : index
    %c0_7 = arith.constant 0 : index
    %9 = vector.load %arg3[%c0_6, %c0_7] : memref<16x32xbf16, #tpu.memory_space<vmem>>, vector<16x32xbf16>
    %c1 = arith.constant 1 : index
    %c0_8 = arith.constant 0 : index
    %10 = vector.load %arg5[%c1, %c0_8] : memref<3x128xf32, #tpu.memory_space<vmem>>, vector<1x32xf32>
    %11 = arith.truncf %8 : vector<256x16xf32> to vector<256x16xbf16>
    %cst_9 = arith.constant dense<0.000000e+00> : vector<256x32xf32>
    %12 = tpu.matmul %11, %9, %cst_9 {dimension_numbers = #tpu.dot_dimension_numbers<[1], [0], [0], [1], [0, 0, 1, 1], [], []>} : vector<256x16xbf16>, vector<16x32xbf16>, vector<256x32xf32> -> vector<256x32xf32>
    %13 = vector.broadcast %10 : vector<1x32xf32> to vector<256x32xf32>
    %14 = arith.addf %12, %13 : vector<256x32xf32>
    %cst_10 = arith.constant 0.000000e+00 : f32
    %15 = vector.broadcast %cst_10 : f32 to vector<256x32xf32>
    %16 = arith.maximumf %14, %15 : vector<256x32xf32>
    %c0_11 = arith.constant 0 : index
    %c0_12 = arith.constant 0 : index
    %17 = vector.load %arg4[%c0_11, %c0_12] : memref<32x128xbf16, #tpu.memory_space<vmem>>, vector<32x128xbf16>
    %c2 = arith.constant 2 : index
    %c0_13 = arith.constant 0 : index
    %18 = vector.load %arg5[%c2, %c0_13] : memref<3x128xf32, #tpu.memory_space<vmem>>, vector<1x128xf32>
    %19 = arith.truncf %16 : vector<256x32xf32> to vector<256x32xbf16>
    %cst_14 = arith.constant dense<0.000000e+00> : vector<256x128xf32>
    %20 = tpu.matmul %19, %17, %cst_14 {dimension_numbers = #tpu.dot_dimension_numbers<[1], [0], [0], [1], [0, 0, 1, 1], [], []>} : vector<256x32xbf16>, vector<32x128xbf16>, vector<256x128xf32> -> vector<256x128xf32>
    %21 = vector.broadcast %18 : vector<1x128xf32> to vector<256x128xf32>
    %22 = arith.addf %20, %21 : vector<256x128xf32>
    %c0_15 = arith.constant 0 : index
    %c0_16 = arith.constant 0 : index
    %23 = vector.load %arg6[%c0_15, %c0_16] : memref<256x128xf32, #tpu.memory_space<vmem>>, vector<256x128xf32>
    tpu.vector_store %arg6[%c0_15, %c0_16], %22 {strides = array<i32>} : memref<256x128xf32, #tpu.memory_space<vmem>>, vector<256x128xf32>,
    return
  }
  func.func @transform_0(%arg0: i32) -> (i32, i32) {
    %c0_i32 = arith.constant 0 : i32
    %c0_i32_0 = arith.constant 0 : i32
    return %arg0, %c0_i32 : i32, i32
  }
  func.func @transform_1(%arg0: i32) -> (i32, i32) {
    %c0_i32 = arith.constant 0 : i32
    %c0_i32_0 = arith.constant 0 : i32
    %c0_i32_1 = arith.constant 0 : i32
    return %c0_i32, %c0_i32_0 : i32, i32
  }
  func.func @transform_2(%arg0: i32) -> (i32, i32) {
    %c0_i32 = arith.constant 0 : i32
    %c0_i32_0 = arith.constant 0 : i32
    %c0_i32_1 = arith.constant 0 : i32
    return %c0_i32, %c0_i32_0 : i32, i32
  }
  func.func @transform_3(%arg0: i32) -> (i32, i32) {
    %c0_i32 = arith.constant 0 : i32
    %c0_i32_0 = arith.constant 0 : i32
    %c0_i32_1 = arith.constant 0 : i32
    return %c0_i32, %c0_i32_0 : i32, i32
  }
  func.func @transform_4(%arg0: i32) -> (i32, i32) {
    %c0_i32 = arith.constant 0 : i32
    %c0_i32_0 = arith.constant 0 : i32
    %c0_i32_1 = arith.constant 0 : i32
    return %c0_i32, %c0_i32_0 : i32, i32
  }
  func.func @transform_5(%arg0: i32) -> (i32, i32) {
    %c0_i32 = arith.constant 0 : i32
    %c0_i32_0 = arith.constant 0 : i32
    return %arg0, %c0_i32 : i32, i32
  }
}

</mosaic_0001>

<bundles_post_ra>
// kernel: variational_decoder_forward.1
= control target key start
LH: loop header
LB: loop body
LE: loop exit
PB: predicated region body
PF: predicated region fallthrough
CT: control target
= control target key end

     0   :  { %s1037_s18 = smov 0   ;;  %s1300_s0 = inlined_call_operand.vmem [shape: f32[512,8], index: 0, kind: input, shape index: {}]   ;;  %s1301_s1 = inlined_call_operand.vmem [shape: bf16[8,16], index: 1, kind: input, shape index: {}]   ;;  %s1302_s2 = inlined_call_operand.vmem [shape: bf16[16,32], index: 2, kind: input, shape index: {}]   ;;  %s1303_s3 = inlined_call_operand.vmem [shape: bf16[32,128], index: 3, kind: input, shape index: {}]   ;;  %s1304_s4 = inlined_call_operand.vmem [shape: f32[3,128], index: 4, kind: input, shape index: {}]   ;;  %s1305_s5 = inlined_call_operand.vmem [shape: f32[512,128], index: 5, kind: output, shape index: {}]  }
   0x1 LB: > { %s910_s19 = sadd.s32 4294967295, %s1005_s18   ;;  %p914_p0 = scmp.ge.s32.totalorder %s1005_s18, 1  ;;  %s1005_s18 = sphi %s1037_s18, %s15_s18  }
   0x2   : > { %p188_p1 = scmp.lt.s32.totalorder %s1005_s18, 3 }
   0x4   : > { %p189_p2 = pnand %p914_p0, %p188_p1 }
   0x5   : > { %s915_s22 = sshll.u32 (!%p189_p2), %s910_s19, 5 }
   0x6   : > { %192 = sbr.rel (%p189_p2) target bundleno = 680 (0x2a8), region = 40  ;;  %p217_p3 = scmp.lt.s32.totalorder (!%p189_p2), %s915_s22, 63 }
   0xb   : > { %v261_v0 = vld [vmem:[%s1301_s1] sm:$0xf]  ;;  %vm329_vm0 = vcmask 1043456   ;;  %s1307_s22 = smov (!%p217_p3, %s915_s22), 63  ;;  %vm280_vm1 = vcmask 64512   ;;  %vm480_vm2 = vcmask 130048  }
   0xc   : > { %v331_v1 = vsel %vm329_vm0, %v261_v0, 0  ;;  %s916_s23 = sshll.u32 %s1307_s22, 3  ;;  %v981_v23 = vld [vmem:[%s1302_s2] sm:$0xff]  ;;  %vm684_vm3 = vcmask 261120  }
   0xd   : > { %340 = vmatpush.bf16.msra.mxu0 %v331_v1  ;;  %984 = vmatpush.bf16.msra.mxu3 %v331_v1  ;;  %s1056_s26 = scalar_lea.vmem %s1300_s0, %s916_s23  ;;  %v1090_v31 = vld [vmem:[%s1304_s4] ss:$0 sm:$0xff]  ;;  %s1210_s16 = scalar_lea.vmem %s1305_s5, %s916_s23 }
   0xe   : > { %v229_v2 = vld [vmem:[%s1056_s26] sm:$0xff]  ;;  %v230_v3 = vld [vmem:[%s1056_s26 + $0x8] sm:$0xff]  ;;  %v231_v5 = vld [vmem:[%s1056_s26 + $0x10] sm:$0xff]  ;;  %536 = vmatpush.bf16.msra.mxu1 %v981_v23 }
   0xf   : > { %v263_v4 = vpack.c.bf16 %v230_v3, %v229_v2  ;;  %v232_v6 = vld [vmem:[%s1056_s26 + $0x18] sm:$0xff]  ;;  %v233_v8 = vld [vmem:[%s1056_s26 + $0x20] sm:$0xff]  ;;  %v234_v9 = vld [vmem:[%s1056_s26 + $0x28] sm:$0xff] }
  0x10   : > { %v264_v7 = vpack.c.bf16 %v232_v6, %v231_v5  ;;  %v265_v10 = vpack.c.bf16 %v234_v9, %v233_v8  ;;  %v235_v11 = vld [vmem:[%s1056_s26 + $0x30] sm:$0xff]  ;;  %v236_v12 = vld [vmem:[%s1056_s26 + $0x38] sm:$0xff]  ;;  %v237_v14 = vld [vmem:[%s1056_s26 + $0x40] sm:$0xff] }
  0x11   : > { %919 = vmatmul.msk.bf16.vlgmr.msra.gmra.mxu0 %vm280_vm1, %v263_v4  ;;  %v266_v13 = vpack.c.bf16 %v236_v12, %v235_v11  ;;  %v238_v15 = vld [vmem:[%s1056_s26 + $0x48] sm:$0xff]  ;;  %v239_v17 = vld [vmem:[%s1056_s26 + $0x50] sm:$0xff]  ;;  %v240_v18 = vld [vmem:[%s1056_s26 + $0x58] sm:$0xff]  ;;  %985 = vmatpush.bf16.msrb.mxu3 %v981_v23 }
  0x12   : > { %v267_v16 = vpack.c.bf16 %v238_v15, %v237_v14  ;;  %v268_v19 = vpack.c.bf16 %v240_v18, %v239_v17  ;;  %v241_v20 = vld [vmem:[%s1056_s26 + $0x60] sm:$0xff]  ;;  %v242_v21 = vld [vmem:[%s1056_s26 + $0x68] sm:$0xff]  ;;  %v243_v24 = vld [vmem:[%s1056_s26 + $0x70] sm:$0xff] }
  0x13   : > { %v269_v22 = vpack.c.bf16 %v242_v21, %v241_v20  ;;  %v244_v25 = vld [vmem:[%s1056_s26 + $0x78] sm:$0xff]  ;;  %v245_v27 = vld [vmem:[%s1056_s26 + $0x80] sm:$0xff]  ;;  %v246_v28 = vld [vmem:[%s1056_s26 + $0x88] sm:$0xff] }
  0x14   : > { %v270_v26 = vpack.c.bf16 %v244_v25, %v243_v24  ;;  %v271_v29 = vpack.c.bf16 %v246_v28, %v245_v27  ;;  %v247_v37 = vld [vmem:[%s1056_s26 + $0x90] sm:$0xff]  ;;  %v248_v38 = vld [vmem:[%s1056_s26 + $0x98] sm:$0xff]  ;;  %v249_v50 = vld [vmem:[%s1056_s26 + $0xa0] sm:$0xff] }
  0x15   : > { %v272_v40 = vpack.c.bf16 %v248_v38, %v247_v37  ;;  %v255_v42 = vld [vmem:[%s1056_s26 + $0xd0] sm:$0xff]  ;;  %v256_v43 = vld [vmem:[%s1056_s26 + $0xd8] sm:$0xff]  ;;  %v250_v51 = vld [vmem:[%s1056_s26 + $0xa8] sm:$0xff] }
  0x16   : > { %v276_v44 = vpack.c.bf16 %v256_v43, %v255_v42  ;;  %v273_v53 = vpack.c.bf16 %v250_v51, %v249_v50  ;;  %v257_v55 = vld [vmem:[%s1056_s26 + $0xe0] sm:$0xff]  ;;  %v258_v56 = vld [vmem:[%s1056_s26 + $0xe8] sm:$0xff]  ;;  %v251_v63 = vld [vmem:[%s1056_s26 + $0xb0] sm:$0xff] }
  0x17   : > { %v277_v57 = vpack.c.bf16 %v258_v56, %v257_v55  ;;  %v252_v0 = vld [vmem:[%s1056_s26 + $0xb8] sm:$0xff]  ;;  %v259_v4 = vld [vmem:[%s1056_s26 + $0xf0] sm:$0xff]  ;;  %v253_v12 = vld [vmem:[%s1056_s26 + $0xc0] sm:$0xff] }
  0x18   : > { %932 = vmatmul.msk.bf16.vlgmr.msra.gmra.mxu3 %vm280_vm1, %v276_v44  ;;  %v274_v2 = vpack.c.bf16 %v252_v0, %v251_v63  ;;  %v260_v5 = vld [vmem:[%s1056_s26 + $0xf8] sm:$0xff]  ;;  %v1149_v55 = vld [vmem:[%s1304_s4 + $0x1] ss:$0 sm:$0xff] }
  0x19   : > { %v278_v6 = vpack.c.bf16 %v260_v5, %v259_v4 }
  0x21   : > { %920 = vmatmul.msk.bf16.gmra.mxu0 %vm280_vm1, %v264_v7 }
  0x28   : > { %933 = vmatmul.msk.bf16.gmra.mxu3 %vm280_vm1, %v277_v57 }
  0x31   : > { %921 = vmatmul.msk.bf16.gmra.mxu0 %vm280_vm1, %v265_v10 }
  0x38   : > { %934 = vmatmul.msk.bf16.gmra.mxu3 %vm280_vm1, %v278_v6 }
  0x41   : > { %922 = vmatmul.msk.bf16.gmra.mxu0 %vm280_vm1, %v266_v13  ;;  %v254_v13 = vld [vmem:[%s1056_s26 + $0xc8] sm:$0xff] }
  0x42   : > { %v275_v15 = vpack.c.bf16 %v254_v13, %v253_v12 }
  0x51   : > { %923 = vmatmul.msk.bf16.gmra.mxu0 %vm280_vm1, %v267_v16 }
  0x61   : > { %924 = vmatmul.msk.bf16.gmra.mxu0 %vm280_vm1, %v268_v19 }
  0x71   : > { %925 = vmatmul.msk.bf16.gmra.mxu0 %vm280_vm1, %v269_v22 }
  0x81   : > { %926 = vmatmul.msk.bf16.gmra.mxu0 %vm280_vm1, %v270_v26 }
  0x8e   : > { %v342_v30 = vpop.f32.mrf.mxu0 }
  0x8f   : > { %v343_v32 = vadd.f32 %v1090_v31, %v342_v30 }
  0x91   : > { %927 = vmatmul.msk.bf16.gmra.mxu0 %vm280_vm1, %v271_v29  ;;  %v422_v35 = vmax.f32 %v343_v32, 0.0 }
  0x96   : > { %v344_v33 = vpop.f32.mrf.mxu0 }
  0x97   : > { %v345_v34 = vadd.f32 %v1090_v31, %v344_v33 }
  0x99   : > { %v423_v36 = vmax.f32 %v345_v34, 0.0 }
  0x9b   : > { %v457_v39 = vpack.c.bf16 %v423_v36, %v422_v35 }
  0x9d   : > { %939 = vmatmul.msk.bf16.vlgmr.msra.gmra.mxu1 %vm480_vm2, %v457_v39  ;;  %v983_v39 = vld [vmem:[%s1303_s3 + $0x8] sm:$0xff] }
  0x9e   : > { %v347_v41 = vpop.f32.mrf.mxu0  ;;  %739 = vmatpush.bf16.msra.mxu2 %v983_v39  ;;  %986 = vmatpush.bf16.msra.mxu3 %v983_v39 }
  0x9f   : > { %v348_v45 = vadd.f32 %v1090_v31, %v347_v41 }
  0xa1   : > { %928 = vmatmul.msk.bf16.gmra.mxu0 %vm280_vm1, %v272_v40  ;;  %v424_v48 = vmax.f32 %v348_v45, 0.0  ;;  %v982_v40 = vld [vmem:[%s1303_s3] sm:$0xff] }
  0xa2   : > { %740 = vmatpush.bf16.msra.mxu2 %v982_v40  ;;  %987 = vmatpush.bf16.msra.mxu3 %v982_v40 }
  0xa6   : > { %v349_v46 = vpop.f32.mrf.mxu0 }
  0xa7   : > { %v350_v47 = vadd.f32 %v1090_v31, %v349_v46 }
  0xa9   : > { %v425_v49 = vmax.f32 %v350_v47, 0.0 }
  0xab   : > { %v458_v52 = vpack.c.bf16 %v425_v49, %v424_v48 }
  0xad   : > { %940 = vmatmul.msk.bf16.gmra.mxu1 %vm480_vm2, %v458_v52 }
  0xae   : > { %v352_v54 = vpop.f32.mrf.mxu0 }
  0xaf   : > { %v353_v58 = vadd.f32 %v1090_v31, %v352_v54 }
  0xb1   : > { %929 = vmatmul.msk.bf16.gmra.mxu0 %vm280_vm1, %v273_v53  ;;  %v426_v61 = vmax.f32 %v353_v58, 0.0 }
  0xb6   : > { %v354_v59 = vpop.f32.mrf.mxu0 }
  0xb7   : > { %v355_v60 = vadd.f32 %v1090_v31, %v354_v59 }
  0xb9   : > { %v427_v62 = vmax.f32 %v355_v60, 0.0 }
  0xbb   : > { %v459_v1 = vpack.c.bf16 %v427_v62, %v426_v61 }
  0xbd   : > { %941 = vmatmul.msk.bf16.gmra.mxu1 %vm480_vm2, %v459_v1 }
  0xbe   : > { %v357_v3 = vpop.f32.mrf.mxu0 }
  0xbf   : > { %v358_v7 = vadd.f32 %v1090_v31, %v357_v3 }
  0xc1   : > { %930 = vmatmul.msk.bf16.gmra.mxu0 %vm280_vm1, %v274_v2  ;;  %v428_v10 = vmax.f32 %v358_v7, 0.0  ;;  %v407_v2 = vpop.f32.mrf.mxu3 }
  0xc2   : > { %v408_v7 = vadd.f32 %v1090_v31, %v407_v2 }
  0xc6   : > { %v359_v8 = vpop.f32.mrf.mxu0 }
  0xc7   : > { %v360_v9 = vadd.f32 %v1090_v31, %v359_v8 }
  0xc9   : > { %v429_v11 = vmax.f32 %v360_v9, 0.0  ;;  %v409_v9 = vpop.f32.mrf.mxu3 }
  0xca   : > { %v410_v12 = vadd.f32 %v1090_v31, %v409_v9 }
  0xcb   : > { %v460_v14 = vpack.c.bf16 %v429_v11, %v428_v10  ;;  %v448_v11 = vmax.f32 %v408_v7, 0.0 }
  0xcd   : > { %942 = vmatmul.msk.bf16.gmra.mxu1 %vm480_vm2, %v460_v14 }
  0xce   : > { %v362_v16 = vpop.f32.mrf.mxu0 }
  0xcf   : > { %v363_v17 = vadd.f32 %v1090_v31, %v362_v16 }
  0xd1   : > { %931 = vmatmul.msk.bf16.gmra.mxu0 %vm280_vm1, %v275_v15  ;;  %v430_v20 = vmax.f32 %v363_v17, 0.0  ;;  %v449_v15 = vmax.f32 %v410_v12, 0.0 }
  0xd6   : > { %v364_v18 = vpop.f32.mrf.mxu0 }
  0xd7   : > { %v365_v19 = vadd.f32 %v1090_v31, %v364_v18 }
  0xd9   : > { %v431_v21 = vmax.f32 %v365_v19, 0.0  ;;  %v470_v19 = vpack.c.bf16 %v449_v15, %v448_v11 }
  0xdb   : > { %v461_v22 = vpack.c.bf16 %v431_v21, %v430_v20  ;;  %952 = vmatmul.msk.bf16.vlgmr.msrb.gmra.mxu3 %vm480_vm2, %v470_v19 }
  0xdd   : > { %943 = vmatmul.msk.bf16.gmra.mxu1 %vm480_vm2, %v461_v22 }
  0xde   : > { %v367_v23 = vpop.f32.mrf.mxu0 }
  0xdf   : > { %v368_v24 = vadd.f32 %v1090_v31, %v367_v23  ;;  %v412_v23 = vpop.f32.mrf.mxu3 }
  0xe1   : > { %v432_v27 = vmax.f32 %v368_v24, 0.0 }
  0xe6   : > { %v369_v25 = vpop.f32.mrf.mxu0 }
  0xe7   : > { %v370_v26 = vadd.f32 %v1090_v31, %v369_v25 }
  0xe9   : > { %v433_v28 = vmax.f32 %v370_v26, 0.0 }
  0xeb   : > { %v462_v29 = vpack.c.bf16 %v433_v28, %v432_v27  ;;  %v413_v28 = vadd.f32 %v1090_v31, %v412_v23 }
  0xed   : > { %944 = vmatmul.msk.bf16.gmra.mxu1 %vm480_vm2, %v462_v29 }
  0xee   : > { %v372_v30 = vpop.f32.mrf.mxu0 }
  0xef   : > { %v373_v32 = vadd.f32 %v1090_v31, %v372_v30  ;;  %v414_v30 = vpop.f32.mrf.mxu3 }
  0xf1   : > { %v434_v35 = vmax.f32 %v373_v32, 0.0 }
  0xf6   : > { %v374_v33 = vpop.f32.mrf.mxu0 }
  0xf7   : > { %v375_v34 = vadd.f32 %v1090_v31, %v374_v33  ;;  %v450_v33 = vmax.f32 %v413_v28, 0.0 }
  0xf9   : > { %v435_v36 = vmax.f32 %v375_v34, 0.0  ;;  %v415_v34 = vadd.f32 %v1090_v31, %v414_v30 }
  0xfb   : > { %v463_v37 = vpack.c.bf16 %v435_v36, %v434_v35 }
  0xfd   : > { %945 = vmatmul.msk.bf16.gmra.mxu1 %vm480_vm2, %v463_v37  ;;  %v451_v37 = vmax.f32 %v415_v34, 0.0 }
  0xfe   : > { %v377_v38 = vpop.f32.mrf.mxu0 }
  0xff   : > { %v378_v41 = vadd.f32 %v1090_v31, %v377_v38 }
 0x101   : > { %v436_v44 = vmax.f32 %v378_v41, 0.0  ;;  %v471_v41 = vpack.c.bf16 %v451_v37, %v450_v33 }
 0x103   : > { %953 = vmatmul.msk.bf16.gmra.mxu3 %vm480_vm2, %v471_v41  ;;  %v1203_v41 = vld [vmem:[%s1304_s4 + $0x2] ss:$0 sm:$0xff] }
 0x106   : > { %v379_v42 = vpop.f32.mrf.mxu0 }
 0x107   : > { %v380_v43 = vadd.f32 %v1090_v31, %v379_v42 }
 0x109   : > { %v437_v45 = vmax.f32 %v380_v43, 0.0 }
 0x10b   : > { %v464_v46 = vpack.c.bf16 %v437_v45, %v436_v44  ;;  %v417_v45 = vpop.f32.mrf.mxu3 }
 0x10d   : > { %946 = vmatmul.msk.bf16.gmra.mxu1 %vm480_vm2, %v464_v46 }
 0x10e   : > { %v382_v47 = vpop.f32.mrf.mxu0 }
 0x10f   : > { %v383_v48 = vadd.f32 %v1090_v31, %v382_v47 }
 0x111   : > { %v438_v51 = vmax.f32 %v383_v48, 0.0 }
 0x116   : > { %v384_v49 = vpop.f32.mrf.mxu0 }
 0x117   : > { %v385_v50 = vadd.f32 %v1090_v31, %v384_v49 }
 0x119   : > { %v439_v52 = vmax.f32 %v385_v50, 0.0  ;;  %v418_v50 = vadd.f32 %v1090_v31, %v417_v45 }
 0x11a   : > { %v538_v53 = vpop.f32.mrf.mxu1 }
 0x11b   : > { %v465_v54 = vpack.c.bf16 %v439_v52, %v438_v51  ;;  %v539_v57 = vadd.f32 %v1149_v55, %v538_v53  ;;  %v419_v52 = vpop.f32.mrf.mxu3 }
 0x11d   : > { %947 = vmatmul.msk.bf16.gmra.mxu1 %vm480_vm2, %v465_v54  ;;  %v618_v60 = vmax.f32 %v539_v57, 0.0  ;;  %v452_v54 = vmax.f32 %v418_v50, 0.0 }
 0x11e   : > { %v387_v56 = vpop.f32.mrf.mxu0 }
 0x11f   : > { %v388_v61 = vadd.f32 %v1090_v31, %v387_v56  ;;  %v420_v56 = vadd.f32 %v1090_v31, %v419_v52 }
 0x121   : > { %v440_v3 = vmax.f32 %v388_v61, 0.0 }
 0x122   : > { %v540_v58 = vpop.f32.mrf.mxu1 }
 0x123   : > { %v541_v59 = vadd.f32 %v1149_v55, %v540_v58 }
 0x125   : > { %v619_v62 = vmax.f32 %v541_v59, 0.0  ;;  %v453_v59 = vmax.f32 %v420_v56, 0.0 }
 0x126   : > { %v389_v63 = vpop.f32.mrf.mxu0 }
 0x127   : > { %v390_v0 = vadd.f32 %v1090_v31, %v389_v63  ;;  %v655_v1 = vpack.c.bf16 %v619_v62, %v618_v60  ;;  %v472_v63 = vpack.c.bf16 %v453_v59, %v452_v54 }
 0x129   : > { %v441_v4 = vmax.f32 %v390_v0, 0.0  ;;  %963 = vmatmul.msk.bf16.vlgmr.msra.gmra.mxu2 %vm684_vm3, %v655_v1  ;;  %954 = vmatmul.msk.bf16.gmra.mxu3 %vm480_vm2, %v472_v63 }
 0x12a   : > { %v543_v5 = vpop.f32.mrf.mxu1 }
 0x12b   : > { %v466_v6 = vpack.c.bf16 %v441_v4, %v440_v3  ;;  %v544_v10 = vadd.f32 %v1149_v55, %v543_v5 }
 0x12d   : > { %948 = vmatmul.msk.bf16.gmra.mxu1 %vm480_vm2, %v466_v6  ;;  %v620_v16 = vmax.f32 %v544_v10, 0.0 }
 0x12e   : > { %v392_v8 = vpop.f32.mrf.mxu0 }
 0x12f   : > { %v393_v17 = vadd.f32 %v1090_v31, %v392_v8 }
 0x131   : > { %v442_v24 = vmax.f32 %v393_v17, 0.0 }
 0x132   : > { %v545_v13 = vpop.f32.mrf.mxu1 }
 0x133   : > { %v546_v14 = vadd.f32 %v1149_v55, %v545_v13 }
 0x135   : > { %v621_v18 = vmax.f32 %v546_v14, 0.0 }
 0x136   : > { %v394_v20 = vpop.f32.mrf.mxu0 }
 0x137   : > { %v656_v21 = vpack.c.bf16 %v621_v18, %v620_v16  ;;  %v395_v22 = vadd.f32 %v1090_v31, %v394_v20 }
 0x139   : > { %v443_v25 = vmax.f32 %v395_v22, 0.0  ;;  %964 = vmatmul.msk.bf16.gmra.mxu2 %vm684_vm3, %v656_v21 }
 0x13a   : > { %v548_v26 = vpop.f32.mrf.mxu1 }
 0x13b   : > { %v467_v27 = vpack.c.bf16 %v443_v25, %v442_v24  ;;  %v549_v32 = vadd.f32 %v1149_v55, %v548_v26 }
 0x13d   : > { %949 = vmatmul.msk.bf16.gmra.mxu1 %vm480_vm2, %v467_v27  ;;  %v622_v38 = vmax.f32 %v549_v32, 0.0 }
 0x13e   : > { %v397_v29 = vpop.f32.mrf.mxu0 }
 0x13f   : > { %v398_v39 = vadd.f32 %v1090_v31, %v397_v29 }
 0x141   : > { %v444_v46 = vmax.f32 %v398_v39, 0.0 }
 0x142   : > { %v550_v35 = vpop.f32.mrf.mxu1 }
 0x143   : > { %v551_v36 = vadd.f32 %v1149_v55, %v550_v35 }
 0x145   : > { %v623_v40 = vmax.f32 %v551_v36, 0.0 }
 0x146   : > { %v399_v42 = vpop.f32.mrf.mxu0 }
 0x147   : > { %v657_v43 = vpack.c.bf16 %v623_v40, %v622_v38  ;;  %v400_v44 = vadd.f32 %v1090_v31, %v399_v42 }
 0x149   : > { %v445_v47 = vmax.f32 %v400_v44, 0.0  ;;  %965 = vmatmul.msk.bf16.gmra.mxu2 %vm684_vm3, %v657_v43 }
 0x14a   : > { %v553_v48 = vpop.f32.mrf.mxu1 }
 0x14b   : > { %v468_v49 = vpack.c.bf16 %v445_v47, %v444_v46  ;;  %v554_v53 = vadd.f32 %v1149_v55, %v553_v48 }
 0x14d   : > { %950 = vmatmul.msk.bf16.gmra.mxu1 %vm480_vm2, %v468_v49  ;;  %v624_v60 = vmax.f32 %v554_v53, 0.0 }
 0x14e   : > { %v402_v51 = vpop.f32.mrf.mxu0 }
 0x14f   : > { %v403_v61 = vadd.f32 %v1090_v31, %v402_v51 }
 0x151   : > { %v446_v3 = vmax.f32 %v403_v61, 0.0 }
 0x152   : > { %v555_v57 = vpop.f32.mrf.mxu1 }
 0x153   : > { %v556_v58 = vadd.f32 %v1149_v55, %v555_v57 }
 0x155   : > { %v625_v62 = vmax.f32 %v556_v58, 0.0 }
 0x156   : > { %v404_v0 = vpop.f32.mrf.mxu0 }
 0x157   : > { %v658_v1 = vpack.c.bf16 %v625_v62, %v624_v60  ;;  %v405_v2 = vadd.f32 %v1090_v31, %v404_v0 }
 0x159   : > { %v447_v4 = vmax.f32 %v405_v2, 0.0  ;;  %966 = vmatmul.msk.bf16.gmra.mxu2 %vm684_vm3, %v658_v1 }
 0x15a   : > { %v558_v5 = vpop.f32.mrf.mxu1 }
 0x15b   : > { %v469_v6 = vpack.c.bf16 %v447_v4, %v446_v3  ;;  %v559_v7 = vadd.f32 %v1149_v55, %v558_v5 }
 0x15d   : > { %951 = vmatmul.msk.bf16.gmra.mxu1 %vm480_vm2, %v469_v6  ;;  %v626_v10 = vmax.f32 %v559_v7, 0.0 }
 0x162   : > { %v560_v8 = vpop.f32.mrf.mxu1 }
 0x163   : > { %v561_v9 = vadd.f32 %v1149_v55, %v560_v8 }
 0x165   : > { %v627_v11 = vmax.f32 %v561_v9, 0.0 }
 0x167   : > { %v659_v12 = vpack.c.bf16 %v627_v11, %v626_v10 }
 0x169   : > { %967 = vmatmul.msk.bf16.gmra.mxu2 %vm684_vm3, %v659_v12 }
 0x16a   : > { %v563_v31 = vpop.f32.mrf.mxu1 }
 0x16b   : > { %v564_v13 = vadd.f32 %v1149_v55, %v563_v31  ;;  %v603_v31 = vpop.f32.mrf.mxu3 }
 0x16d   : > { %v628_v16 = vmax.f32 %v564_v13, 0.0 }
 0x172   : > { %v565_v14 = vpop.f32.mrf.mxu1 }
 0x173   : > { %v566_v15 = vadd.f32 %v1149_v55, %v565_v14 }
 0x175   : > { %v629_v17 = vmax.f32 %v566_v15, 0.0 }
 0x177   : > { %v660_v18 = vpack.c.bf16 %v629_v17, %v628_v16 }
 0x179   : > { %968 = vmatmul.msk.bf16.gmra.mxu2 %vm684_vm3, %v660_v18  ;;  %v605_v18 = vpop.f32.mrf.mxu3 }
 0x17a   : > { %v568_v19 = vpop.f32.mrf.mxu1 }
 0x17b   : > { %v569_v20 = vadd.f32 %v1149_v55, %v568_v19 }
 0x17d   : > { %v630_v23 = vmax.f32 %v569_v20, 0.0 }
 0x182   : > { %v570_v21 = vpop.f32.mrf.mxu1 }
 0x183   : > { %v571_v22 = vadd.f32 %v1149_v55, %v570_v21 }
 0x185   : > { %v631_v24 = vmax.f32 %v571_v22, 0.0 }
 0x187   : > { %v661_v25 = vpack.c.bf16 %v631_v24, %v630_v23 }
 0x189   : > { %969 = vmatmul.msk.bf16.gmra.mxu2 %vm684_vm3, %v661_v25 }
 0x18a   : > { %v573_v26 = vpop.f32.mrf.mxu1 }
 0x18b   : > { %v574_v27 = vadd.f32 %v1149_v55, %v573_v26  ;;  %v608_v26 = vpop.f32.mrf.mxu3 }
 0x18d   : > { %v632_v30 = vmax.f32 %v574_v27, 0.0  ;;  %v604_v27 = vadd.f32 %v1149_v55, %v603_v31 }
 0x192   : > { %v575_v28 = vpop.f32.mrf.mxu1 }
 0x193   : > { %v576_v29 = vadd.f32 %v1149_v55, %v575_v28  ;;  %v606_v28 = vadd.f32 %v1149_v55, %v605_v18 }
 0x195   : > { %v633_v32 = vmax.f32 %v576_v29, 0.0  ;;  %v644_v29 = vmax.f32 %v604_v27, 0.0 }
 0x197   : > { %v662_v33 = vpack.c.bf16 %v633_v32, %v632_v30  ;;  %v645_v30 = vmax.f32 %v606_v28, 0.0 }
 0x199   : > { %970 = vmatmul.msk.bf16.gmra.mxu2 %vm684_vm3, %v662_v33 }
 0x19a   : > { %v578_v34 = vpop.f32.mrf.mxu1 }
 0x19b   : > { %v579_v35 = vadd.f32 %v1149_v55, %v578_v34  ;;  %v668_v34 = vpack.c.bf16 %v645_v30, %v644_v29 }
 0x19d   : > { %v634_v38 = vmax.f32 %v579_v35, 0.0  ;;  %v610_v35 = vpop.f32.mrf.mxu3 }
 0x1a2   : > { %v580_v36 = vpop.f32.mrf.mxu1 }
 0x1a3   : > { %v581_v37 = vadd.f32 %v1149_v55, %v580_v36 }
 0x1a5   : > { %v635_v39 = vmax.f32 %v581_v37, 0.0 }
 0x1a7   : > { %v663_v40 = vpack.c.bf16 %v635_v39, %v634_v38  ;;  %v609_v38 = vadd.f32 %v1149_v55, %v608_v26  ;;  %v611_v39 = vadd.f32 %v1149_v55, %v610_v35 }
 0x1a9   : > { %971 = vmatmul.msk.bf16.gmra.mxu2 %vm684_vm3, %v663_v40 }
 0x1aa   : > { %v583_v42 = vpop.f32.mrf.mxu1 }
 0x1ab   : > { %v584_v45 = vadd.f32 %v1149_v55, %v583_v42  ;;  %v646_v42 = vmax.f32 %v609_v38, 0.0 }
 0x1ac   : > { %v742_v43 = vpop.f32.mrf.mxu2  ;;  %v613_v40 = vpop.f32.mrf.mxu3 }
 0x1ad   : > { %v743_v44 = vadd.f32 %v1203_v41, %v742_v43  ;;  %v636_v49 = vmax.f32 %v584_v45, 0.0  ;;  %v647_v43 = vmax.f32 %v611_v39, 0.0 }
 0x1af   : > { %822 = vst [vmem:[%s1210_s16] sm:$0xff] %v743_v44 }
 0x1b2   : > { %v585_v46 = vpop.f32.mrf.mxu1 }
 0x1b3   : > { %v586_v47 = vadd.f32 %v1149_v55, %v585_v46  ;;  %v669_v46 = vpack.c.bf16 %v647_v43, %v646_v42 }
 0x1b4   : > { %v744_v48 = vpop.f32.mrf.mxu2 }
 0x1b5   : > { %v637_v50 = vmax.f32 %v586_v47, 0.0  ;;  %v745_v51 = vadd.f32 %v1203_v41, %v744_v48  ;;  %v615_v47 = vpop.f32.mrf.mxu3 }
 0x1b7   : > { %v664_v52 = vpack.c.bf16 %v637_v50, %v636_v49  ;;  %823 = vst [vmem:[%s1210_s16 + $0x8] sm:$0xff] %v745_v51  ;;  %v614_v50 = vadd.f32 %v1149_v55, %v613_v40  ;;  %v616_v51 = vadd.f32 %v1149_v55, %v615_v47 }
 0x1b9   : > { %972 = vmatmul.msk.bf16.gmra.mxu2 %vm684_vm3, %v664_v52  ;;  %v648_v52 = vmax.f32 %v614_v50, 0.0 }
 0x1ba   : > { %v588_v53 = vpop.f32.mrf.mxu1 }
 0x1bb   : > { %v589_v57 = vadd.f32 %v1149_v55, %v588_v53  ;;  %v649_v53 = vmax.f32 %v616_v51, 0.0 }
 0x1bc   : > { %v747_v54 = vpop.f32.mrf.mxu2 }
 0x1bd   : > { %v748_v56 = vadd.f32 %v1203_v41, %v747_v54  ;;  %v638_v61 = vmax.f32 %v589_v57, 0.0  ;;  %v670_v57 = vpack.c.bf16 %v649_v53, %v648_v52 }
 0x1bf   : > { %824 = vst [vmem:[%s1210_s16 + $0x10] sm:$0xff] %v748_v56 }
 0x1c2   : > { %v590_v58 = vpop.f32.mrf.mxu1 }
 0x1c3   : > { %v591_v59 = vadd.f32 %v1149_v55, %v590_v58 }
 0x1c4   : > { %v749_v60 = vpop.f32.mrf.mxu2 }
 0x1c5   : > { %v639_v62 = vmax.f32 %v591_v59, 0.0  ;;  %v750_v63 = vadd.f32 %v1203_v41, %v749_v60 }
 0x1c7   : > { %v665_v0 = vpack.c.bf16 %v639_v62, %v638_v61  ;;  %825 = vst [vmem:[%s1210_s16 + $0x18] sm:$0xff] %v750_v63 }
 0x1c9   : > { %973 = vmatmul.msk.bf16.gmra.mxu2 %vm684_vm3, %v665_v0 }
 0x1ca   : > { %v593_v1 = vpop.f32.mrf.mxu1 }
 0x1cb   : > { %v594_v4 = vadd.f32 %v1149_v55, %v593_v1 }
 0x1cc   : > { %v752_v2 = vpop.f32.mrf.mxu2 }
 0x1cd   : > { %v753_v3 = vadd.f32 %v1203_v41, %v752_v2  ;;  %v640_v8 = vmax.f32 %v594_v4, 0.0 }
 0x1cf   : > { %826 = vst [vmem:[%s1210_s16 + $0x20] sm:$0xff] %v753_v3 }
 0x1d2   : > { %v595_v5 = vpop.f32.mrf.mxu1 }
 0x1d3   : > { %v596_v6 = vadd.f32 %v1149_v55, %v595_v5 }
 0x1d4   : > { %v754_v7 = vpop.f32.mrf.mxu2 }
 0x1d5   : > { %v641_v9 = vmax.f32 %v596_v6, 0.0  ;;  %v755_v10 = vadd.f32 %v1203_v41, %v754_v7 }
 0x1d7   : > { %v666_v11 = vpack.c.bf16 %v641_v9, %v640_v8  ;;  %827 = vst [vmem:[%s1210_s16 + $0x28] sm:$0xff] %v755_v10 }
 0x1d9   : > { %974 = vmatmul.msk.bf16.gmra.mxu2 %vm684_vm3, %v666_v11 }
 0x1da   : > { %v598_v12 = vpop.f32.mrf.mxu1 }
 0x1db   : > { %v599_v15 = vadd.f32 %v1149_v55, %v598_v12 }
 0x1dc   : > { %v757_v13 = vpop.f32.mrf.mxu2 }
 0x1dd   : > { %v758_v14 = vadd.f32 %v1203_v41, %v757_v13  ;;  %v642_v20 = vmax.f32 %v599_v15, 0.0 }
 0x1df   : > { %828 = vst [vmem:[%s1210_s16 + $0x30] sm:$0xff] %v758_v14 }
 0x1e2   : > { %v600_v16 = vpop.f32.mrf.mxu1 }
 0x1e3   : > { %v601_v17 = vadd.f32 %v1149_v55, %v600_v16 }
 0x1e4   : > { %v759_v19 = vpop.f32.mrf.mxu2 }
 0x1e5   : > { %v643_v21 = vmax.f32 %v601_v17, 0.0  ;;  %v760_v22 = vadd.f32 %v1203_v41, %v759_v19 }
 0x1e7   : > { %v667_v23 = vpack.c.bf16 %v643_v21, %v642_v20  ;;  %829 = vst [vmem:[%s1210_s16 + $0x38] sm:$0xff] %v760_v22 }
 0x1e9   : > { %975 = vmatmul.msk.bf16.vlgmr.msra.gmra.mxu3 %vm684_vm3, %v667_v23 }
 0x1ec   : > { %v762_v24 = vpop.f32.mrf.mxu2 }
 0x1ed   : > { %v763_v25 = vadd.f32 %v1203_v41, %v762_v24 }
 0x1ef   : > { %830 = vst [vmem:[%s1210_s16 + $0x40] sm:$0xff] %v763_v25 }
 0x1f4   : > { %v764_v32 = vpop.f32.mrf.mxu2 }
 0x1f5   : > { %v765_v33 = vadd.f32 %v1203_v41, %v764_v32 }
 0x1f7   : > { %831 = vst [vmem:[%s1210_s16 + $0x48] sm:$0xff] %v765_v33 }
 0x1f9   : > { %976 = vmatmul.msk.bf16.gmra.mxu3 %vm684_vm3, %v668_v34 }
 0x1fc   : > { %v767_v36 = vpop.f32.mrf.mxu2 }
 0x1fd   : > { %v768_v37 = vadd.f32 %v1203_v41, %v767_v36 }
 0x1ff   : > { %832 = vst [vmem:[%s1210_s16 + $0x50] sm:$0xff] %v768_v37 }
 0x204   : > { %v769_v44 = vpop.f32.mrf.mxu2 }
 0x205   : > { %v770_v45 = vadd.f32 %v1203_v41, %v769_v44 }
 0x207   : > { %833 = vst [vmem:[%s1210_s16 + $0x58] sm:$0xff] %v770_v45 }
 0x209   : > { %977 = vmatmul.msk.bf16.gmra.mxu3 %vm684_vm3, %v669_v46 }
 0x20c   : > { %v772_v48 = vpop.f32.mrf.mxu2 }
 0x20d   : > { %v773_v49 = vadd.f32 %v1203_v41, %v772_v48 }
 0x20f   : > { %834 = vst [vmem:[%s1210_s16 + $0x60] sm:$0xff] %v773_v49 }
 0x214   : > { %v774_v54 = vpop.f32.mrf.mxu2 }
 0x215   : > { %v775_v56 = vadd.f32 %v1203_v41, %v774_v54 }
 0x217   : > { %835 = vst [vmem:[%s1210_s16 + $0x68] sm:$0xff] %v775_v56 }
 0x219   : > { %978 = vmatmul.msk.bf16.gmra.mxu3 %vm684_vm3, %v670_v57 }
 0x21c   : > { %v777_v58 = vpop.f32.mrf.mxu2 }
 0x21d   : > { %v778_v59 = vadd.f32 %v1203_v41, %v777_v58 }
 0x21f   : > { %836 = vst [vmem:[%s1210_s16 + $0x70] sm:$0xff] %v778_v59 }
 0x224   : > { %v779_v60 = vpop.f32.mrf.mxu2 }
 0x225   : > { %v780_v55 = vadd.f32 %v1203_v41, %v779_v60 }
 0x227   : > { %837 = vst [vmem:[%s1210_s16 + $0x78] sm:$0xff] %v780_v55 }
 0x22c   : > { %v782_v61 = vpop.f32.mrf.mxu2 }
 0x22d   : > { %v783_v62 = vadd.f32 %v1203_v41, %v782_v61 }
 0x22f   : > { %838 = vst [vmem:[%s1210_s16 + $0x80] sm:$0xff] %v783_v62 }
 0x234   : > { %v784_v63 = vpop.f32.mrf.mxu2 }
 0x235   : > { %v785_v0 = vadd.f32 %v1203_v41, %v784_v63 }
 0x237   : > { %839 = vst [vmem:[%s1210_s16 + $0x88] sm:$0xff] %v785_v0 }
 0x23c   : > { %v787_v1 = vpop.f32.mrf.mxu2 }
 0x23d   : > { %v788_v2 = vadd.f32 %v1203_v41, %v787_v1 }
 0x23f   : > { %840 = vst [vmem:[%s1210_s16 + $0x90] sm:$0xff] %v788_v2 }
 0x244   : > { %v789_v3 = vpop.f32.mrf.mxu2 }
 0x245   : > { %v790_v4 = vadd.f32 %v1203_v41, %v789_v3 }
 0x247   : > { %841 = vst [vmem:[%s1210_s16 + $0x98] sm:$0xff] %v790_v4 }
 0x24c   : > { %v792_v5 = vpop.f32.mrf.mxu2 }
 0x24d   : > { %v793_v6 = vadd.f32 %v1203_v41, %v792_v5 }
 0x24f   : > { %842 = vst [vmem:[%s1210_s16 + $0xa0] sm:$0xff] %v793_v6 }
 0x254   : > { %v794_v7 = vpop.f32.mrf.mxu2 }
 0x255   : > { %v795_v8 = vadd.f32 %v1203_v41, %v794_v7 }
 0x257   : > { %843 = vst [vmem:[%s1210_s16 + $0xa8] sm:$0xff] %v795_v8 }
 0x25c   : > { %v797_v9 = vpop.f32.mrf.mxu2 }
 0x25d   : > { %v798_v10 = vadd.f32 %v1203_v41, %v797_v9 }
 0x25f   : > { %844 = vst [vmem:[%s1210_s16 + $0xb0] sm:$0xff] %v798_v10 }
 0x264   : > { %v799_v11 = vpop.f32.mrf.mxu2 }
 0x265   : > { %v800_v12 = vadd.f32 %v1203_v41, %v799_v11 }
 0x267   : > { %845 = vst [vmem:[%s1210_s16 + $0xb8] sm:$0xff] %v800_v12 }
 0x26c   : > { %v802_v31 = vpop.f32.mrf.mxu3 }
 0x26d   : > { %v803_v13 = vadd.f32 %v1203_v41, %v802_v31 }
 0x26f   : > { %846 = vst [vmem:[%s1210_s16 + $0xc0] sm:$0xff] %v803_v13 }
 0x274   : > { %v804_v14 = vpop.f32.mrf.mxu3 }
 0x275   : > { %v805_v15 = vadd.f32 %v1203_v41, %v804_v14 }
 0x277   : > { %847 = vst [vmem:[%s1210_s16 + $0xc8] sm:$0xff] %v805_v15 }
 0x27c   : > { %v807_v16 = vpop.f32.mrf.mxu3 }
 0x27d   : > { %v808_v17 = vadd.f32 %v1203_v41, %v807_v16 }
 0x27f   : > { %848 = vst [vmem:[%s1210_s16 + $0xd0] sm:$0xff] %v808_v17 }
 0x284   : > { %v809_v18 = vpop.f32.mrf.mxu3 }
 0x285   : > { %v810_v19 = vadd.f32 %v1203_v41, %v809_v18 }
 0x287   : > { %849 = vst [vmem:[%s1210_s16 + $0xd8] sm:$0xff] %v810_v19 }
 0x28c   : > { %v812_v20 = vpop.f32.mrf.mxu3 }
 0x28d   : > { %v813_v21 = vadd.f32 %v1203_v41, %v812_v20 }
 0x28f   : > { %850 = vst [vmem:[%s1210_s16 + $0xe0] sm:$0xff] %v813_v21 }
 0x294   : > { %v814_v22 = vpop.f32.mrf.mxu3 }
 0x295   : > { %v815_v23 = vadd.f32 %v1203_v41, %v814_v22 }
 0x297   : > { %851 = vst [vmem:[%s1210_s16 + $0xe8] sm:$0xff] %v815_v23 }
 0x29c   : > { %v817_v24 = vpop.f32.mrf.mxu3 }
 0x29d   : > { %v818_v25 = vadd.f32 %v1203_v41, %v817_v24 }
 0x29f   : > { %852 = vst [vmem:[%s1210_s16 + $0xf0] sm:$0xff] %v818_v25 }
 0x2a4   : > { %v819_v26 = vpop.f32.mrf.mxu3 }
 0x2a5   : > { %v820_v27 = vadd.f32 %v1203_v41, %v819_v26 }
 0x2a7   : > { %853 = vst [vmem:[%s1210_s16 + $0xf8] sm:$0xff] %v820_v27 }
 0x2a8 PF: > { %s15_s18 = sadd.s32 1, %s1005_s18  }
 0x2a9   : > { %p12_p4 = scmp.ge.s32.totalorder %s15_s18, 4  }
 0x2ab   :  { %14 = sbr.rel (!%p12_p4) target bundleno = 1 (0x1), region = 70 }

</bundles_post_ra>
